<compile_context>
chip_gen: v7x
topology: tpu7x:2x2x1
jax: 0.10.0
libtpu: 0.0.40
codegen_flags: <defaults>
</compile_context>

<pallas_src>
import functools

import jax
import jax.numpy as jnp
import numpy as np
from jax.experimental import pallas as pl
from jax.experimental.pallas import tpu as pltpu

# Conservative budgets: keep double-buffered tiles well under v7x's 64 MiB/TC VMEM.
_VMEM_TILE_BUDGET = 40 * 1024 * 1024
_VMEM_LIMIT_BYTES = 48 * 1024 * 1024


def _round_up(x, m):
    return (x + m - 1) // m * m


def _pick_tile(dim, pref, align):
    """Largest tile <= ~pref, `align`-aligned, minimizing padding of `dim`."""
    if dim <= pref:
        return _round_up(dim, align)
    nblk = -(-dim // pref)              # ceil
    return _round_up(-(-dim // nblk), align)


# ----------------------------------------------------------------------------
# Kernels
# ----------------------------------------------------------------------------
def _linear_bias_kernel(x_ref, w_ref, b_ref, o_ref):
    """Full-K path: one (tm, tn) output tile = x_tile @ W_panel + b, no reduction axis."""
    o_ref[...] = (
        jnp.dot(x_ref[...], w_ref[...], preferred_element_type=jnp.float32)
        + b_ref[...]
    ).astype(o_ref.dtype)


def _linear_bias_acc_kernel(x_ref, w_ref, b_ref, o_ref, acc_ref):
    """K-tiled path: accumulate over the last grid axis; bias folded into acc init."""
    k = pl.program_id(2)

    @pl.when(k == 0)
    def _():
        # Init accumulator directly with the broadcast bias (saves a zero pass
        # and the final add).
        acc_ref[...] = jnp.broadcast_to(
            b_ref[...].astype(jnp.float32), acc_ref.shape
        )

    acc_ref[...] += jnp.dot(
        x_ref[...], w_ref[...], preferred_element_type=jnp.float32
    )

    @pl.when(k == pl.num_programs(2) - 1)
    def _():
        o_ref[...] = acc_ref[...].astype(o_ref.dtype)


# ----------------------------------------------------------------------------
# Wrapper
# ----------------------------------------------------------------------------
@functools.partial(jax.jit, static_argnames=("tm", "tn", "tk"))
def sparse_input_linear(x, weight, bias, *, tm=None, tn=None, tk=None):
    M, K = x.shape
    Kw, N = weight.shape
    assert K == Kw and bias.shape == (N,)
    out_dtype = x.dtype

    # ---- tile selection -----------------------------------------------------
    if tm is None:
        tm = _pick_tile(M, 256, 8)        # sublane-aligned
    else:
        tm = _round_up(tm, 8)
    if tn is None:
        tn = _pick_tile(N, 512, 128)      # lane-dense, wide-N output
    else:
        tn = _round_up(tn, 128)

    def _full_k_bytes(k):
        # double-buffered x, W, out tiles + bias, all f32
        return 4 * (2 * (tm * k + k * tn + tm * tn) + 2 * tn)

    if tk is None:
        if _full_k_bytes(K) <= _VMEM_TILE_BUDGET:
            tk = K                        # keep the whole K panel resident
        else:
            tk = _pick_tile(K, 512, 128)
    elif tk >= K:
        tk = K
    else:
        tk = _round_up(tk, 128)
    use_k_grid = tk < K

    # ---- pad to tile multiples (zeros are neutral for the matmul) -----------
    Mp = _round_up(M, tm)
    Np = _round_up(N, tn)
    Kp = _round_up(K, tk) if use_k_grid else K

    xp = x if (Mp == M and Kp == K) else jnp.pad(x, ((0, Mp - M), (0, Kp - K)))
    wp = weight if (Kp == K and Np == N) else jnp.pad(
        weight, ((0, Kp - K), (0, Np - N))
    )
    bp = (bias if Np == N else jnp.pad(bias, (0, Np - N))).reshape(1, Np)

    if not use_k_grid:
        # ---- full-K path: pure parallel 2-D grid, no accumulator -----------
        yp = pl.pallas_call(
            _linear_bias_kernel,
            out_shape=jax.ShapeDtypeStruct((Mp, Np), out_dtype),
            grid_spec=pltpu.PrefetchScalarGridSpec(
                num_scalar_prefetch=0,
                grid=(Mp // tm, Np // tn),
                in_specs=[
                    pl.BlockSpec((tm, K), lambda i, j: (i, 0)),   # x row panel
                    pl.BlockSpec((K, tn), lambda i, j: (0, j)),   # W column panel
                    pl.BlockSpec((1, tn), lambda i, j: (0, j)),   # bias slice
                ],
                out_specs=pl.BlockSpec((tm, tn), lambda i, j: (i, j)),
            ),
            compiler_params=pltpu.CompilerParams(
                dimension_semantics=("parallel", "parallel"),
                vmem_limit_bytes=_VMEM_LIMIT_BYTES,
            ),
        )(xp, wp, bp)
    else:
        # ---- large-K path: reduction axis last, f32 accumulator ------------
        yp = pl.pallas_call(
            _linear_bias_acc_kernel,
            out_shape=jax.ShapeDtypeStruct((Mp, Np), out_dtype),
            grid_spec=pltpu.PrefetchScalarGridSpec(
                num_scalar_prefetch=0,
                grid=(Mp // tm, Np // tn, Kp // tk),
                in_specs=[
                    pl.BlockSpec((tm, tk), lambda i, j, k: (i, k)),
                    pl.BlockSpec((tk, tn), lambda i, j, k: (k, j)),
                    pl.BlockSpec((1, tn), lambda i, j, k: (0, j)),
                ],
                out_specs=pl.BlockSpec((tm, tn), lambda i, j, k: (i, j)),
                scratch_shapes=[pltpu.VMEM((tm, tn), jnp.float32)],
            ),
            compiler_params=pltpu.CompilerParams(
                dimension_semantics=("parallel", "parallel", "arbitrary"),
                vmem_limit_bytes=_VMEM_LIMIT_BYTES,
            ),
        )(xp, wp, bp)

    return yp[:M, :N]


def init_params(key, inp_dim, out_dim):
    """Match SparseInputLinear.reset_parameters: U(-stdv, stdv), stdv=1/sqrt(out_dim)."""
    stdv = 1.0 / np.sqrt(out_dim)
    kw, kb = jax.random.split(key)
    weight = jax.random.uniform(
        kw, (inp_dim, out_dim), dtype=jnp.float32, minval=-stdv, maxval=stdv
    )
    bias = jax.random.uniform(
        kb, (out_dim,), dtype=jnp.float32, minval=-stdv, maxval=stdv
    )
    return weight, bias


if __name__ == "__main__":
    key = jax.random.PRNGKey(0)

    # --- Case 1: typical DisenKGAT-ish small shapes, non-divisible M/N -------
    #   exercises the full-K (no reduction axis) path + padding/slicing.
    k1, k2, key = jax.random.split(key, 3)
    M1, K1, N1 = 300, 96, 200
    x1 = jax.random.normal(k1, (M1, K1), dtype=jnp.float32)
    w1, b1 = init_params(k2, K1, N1)
    y1 = jax.block_until_ready(sparse_input_linear(x1, w1, b1))
    np.testing.assert_allclose(
        np.asarray(y1), np.asarray(x1 @ w1 + b1), rtol=1e-5, atol=1e-5
    )

    # --- Case 2: force the K-tiled (accumulator) path with explicit tk -------
    k3, k4, _ = jax.random.split(key, 3)
    M2, K2, N2 = 128, 256, 256
    x2 = jax.random.normal(k3, (M2, K2), dtype=jnp.float32)
    w2, b2 = init_params(k4, K2, N2)
    y2 = jax.block_until_ready(sparse_input_linear(x2, w2, b2, tk=128))
    np.testing.assert_allclose(
        np.asarray(y2), np.asarray(x2 @ w2 + b2), rtol=1e-5, atol=1e-5
    )

    print("KERNEL_OK")
</pallas_src>

<mosaic_0001>
module attributes {stable_mosaic.version = 11 : i64} {
  func.func @_linear_bias_kernel(%arg0: i32, %arg1: i32, %arg2: memref<152x96xf32, #tpu.memory_space<vmem>>, %arg3: memref<96x256xf32, #tpu.memory_space<vmem>>, %arg4: memref<1x256xf32, #tpu.memory_space<vmem>>, %arg5: memref<152x256xf32, #tpu.memory_space<vmem>>) attributes {dimension_semantics = [#tpu.dimension_semantics<parallel>, #tpu.dimension_semantics<parallel>], iteration_bounds = array<i64: 2, 1>, scalar_prefetch = 0 : i64, scratch_operands = 0 : i64, tpu.core_type = #tpu.core_type<tc>, window_params = [{transform_indices = @transform_0, window_bounds = array<i64: 152, 96>}, {transform_indices = @transform_1, window_bounds = array<i64: 96, 256>}, {transform_indices = @transform_2, window_bounds = array<i64: 1, 256>}, {transform_indices = @transform_3, window_bounds = array<i64: 152, 256>}]} {
    %c0 = arith.constant 0 : index
    %c0_0 = arith.constant 0 : index
    %0 = vector.load %arg2[%c0, %c0_0] : memref<152x96xf32, #tpu.memory_space<vmem>>, vector<152x96xf32>
    %c0_1 = arith.constant 0 : index
    %c0_2 = arith.constant 0 : index
    %1 = vector.load %arg3[%c0_1, %c0_2] : memref<96x256xf32, #tpu.memory_space<vmem>>, vector<96x256xf32>
    %cst = arith.constant dense<0.000000e+00> : vector<152x256xf32>
    %2 = tpu.matmul %0, %1, %cst {dimension_numbers = #tpu.dot_dimension_numbers<[1], [0], [0], [1], [0, 0, 1, 1], [], []>} : vector<152x96xf32>, vector<96x256xf32>, vector<152x256xf32> -> vector<152x256xf32>
    %c0_3 = arith.constant 0 : index
    %c0_4 = arith.constant 0 : index
    %3 = vector.load %arg4[%c0_3, %c0_4] : memref<1x256xf32, #tpu.memory_space<vmem>>, vector<1x256xf32>
    %4 = vector.broadcast %3 : vector<1x256xf32> to vector<152x256xf32>
    %5 = arith.addf %2, %4 : vector<152x256xf32>
    %c0_5 = arith.constant 0 : index
    %c0_6 = arith.constant 0 : index
    %6 = vector.load %arg5[%c0_5, %c0_6] : memref<152x256xf32, #tpu.memory_space<vmem>>, vector<152x256xf32>
    tpu.vector_store %arg5[%c0_5, %c0_6], %5 {strides = array<i32>} : memref<152x256xf32, #tpu.memory_space<vmem>>, vector<152x256xf32>,
    return
  }
  func.func @transform_0(%arg0: i32, %arg1: i32) -> (i32, i32) {
    %c0_i32 = arith.constant 0 : i32
    %c0_i32_0 = arith.constant 0 : i32
    return %arg0, %c0_i32 : i32, i32
  }
  func.func @transform_1(%arg0: i32, %arg1: i32) -> (i32, i32) {
    %c0_i32 = arith.constant 0 : i32
    %c0_i32_0 = arith.constant 0 : i32
    return %c0_i32, %arg1 : i32, i32
  }
  func.func @transform_2(%arg0: i32, %arg1: i32) -> (i32, i32) {
    %c0_i32 = arith.constant 0 : i32
    %c0_i32_0 = arith.constant 0 : i32
    return %c0_i32, %arg1 : i32, i32
  }
  func.func @transform_3(%arg0: i32, %arg1: i32) -> (i32, i32) {
    %c0_i32 = arith.constant 0 : i32
    return %arg0, %arg1 : i32, i32
  }
}

</mosaic_0001>

<bundles_post_ra>
// kernel: sparse_input_linear.1
= control target key start
LH: loop header
LB: loop body
LE: loop exit
PB: predicated region body
PF: predicated region fallthrough
CT: control target
= control target key end

     0   :  { %s819_s12 = smov 0   ;;  %s821_s13 = smov 0   ;;  %s1075_s0 = inlined_call_operand.vmem [shape: f32[304,96], index: 0, kind: input, shape index: {}]   ;;  %s1076_s1 = inlined_call_operand.vmem [shape: f32[96,256], index: 1, kind: input, shape index: {}]   ;;  %s1077_s2 = inlined_call_operand.vmem [shape: f32[1,256], index: 2, kind: input, shape index: {}]   ;;  %s1078_s3 = inlined_call_operand.vmem [shape: f32[304,256], index: 3, kind: output, shape index: {}]  }
   0x1   :  { %s823_s14 = smov 0  }
   0x2 LB: > { %s25_s15 = sadd.s32 1, %s792_s13  ;;  %p687_p0 = scmp.ge.s32.totalorder %s796_s14, 1  ;;  %s796_s14 = sphi %s823_s14, %s13_s14   ;;  %s792_s13 = sphi %s821_s13, %s1080_s13   ;;  %s788_s12 = sphi %s819_s12, %s1079_s12  }
   0x3   : > { %p27_p1 = scmp.ge.s32.totalorder %s25_s15, 2  ;;  %p173_p2 = scmp.lt.s32.totalorder %s796_s14, 3 }
   0x5   : > { %s1082_s15 = smov (%p27_p1, %s25_s15), 0  ;;  %p174_p3 = pnand %p687_p0, %p173_p2 }
   0x6   : > { %v260_v0 = vld [vmem:[%s1076_s1 + $0x8] sm:$0xff] (!%p174_p3)  ;;  %v262_v1 = vld [vmem:[%s1076_s1 + $0x18] sm:$0xff] (!%p174_p3)  ;;  %v259_v2 = vld [vmem:[%s1076_s1] sm:$0xff] (!%p174_p3)  ;;  %v798_v7 = vmov (!%p174_p3), 0.0   ;;  %s211_s21 = smul.u32 (!%p174_p3), 19, %s788_s12  ;;  %vm295_vm0 = vcmask (!%p174_p3), 785408   ;;  %v285_v56 = vlaneseq (!%p174_p3) }
   0x7   : > { %177 = sbr.rel (%p174_p3) target bundleno = 285 (0x11d), region = 32  ;;  %v713_v3 = vpack.c.bf16 (!%p174_p3), %v262_v1, %v260_v0  ;;  %v261_v4 = vld [vmem:[%s1076_s1 + $0x10] sm:$0xff] (!%p174_p3)  ;;  %v264_v5 = vld [vmem:[%s1076_s1 + $0x28] sm:$0xff] (!%p174_p3)  ;;  %v266_v6 = vld [vmem:[%s1076_s1 + $0x38] sm:$0xff] (!%p174_p3)  ;;  %417 = vmatprep.mubr.f32.mxu0 (!%p174_p3), %v798_v7  ;;  %477 = vmatprep.mubr.f32.mxu1 (!%p174_p3), %v798_v7 }
   0x8   : > { %v715_v8 = vpack.c.bf16 (!%p174_p3), %v261_v4, %v259_v2  ;;  %v717_v9 = vpack.c.bf16 (!%p174_p3), %v266_v6, %v264_v5  ;;  %v263_v10 = vld [vmem:[%s1076_s1 + $0x20] sm:$0xff] (!%p174_p3)  ;;  %v265_v11 = vld [vmem:[%s1076_s1 + $0x30] sm:$0xff] (!%p174_p3)  ;;  %v268_v12 = vld [vmem:[%s1076_s1 + $0x48] sm:$0xff] (!%p174_p3)  ;;  %p212_p4 = scmp.lt.s32.totalorder (!%p174_p3), %s211_s21, 37  ;;  %v286_v57 = vshrl.u32 (!%p174_p3), %v285_v56, 7 }
   0x9   : > { %714 = vmatprep.subr.bf16.mxu0 (!%p174_p3), %v713_v3  ;;  %737 = vmatprep.subr.bf16.mxu1 (!%p174_p3), %v713_v3  ;;  %v270_v13 = vld [vmem:[%s1076_s1 + $0x58] sm:$0xff] (!%p174_p3)  ;;  %v719_v14 = vpack.c.bf16 (!%p174_p3), %v265_v11, %v263_v10  ;;  %v267_v16 = vld [vmem:[%s1076_s1 + $0x40] sm:$0xff] (!%p174_p3)  ;;  %v269_v17 = vld [vmem:[%s1076_s1 + $0x50] sm:$0xff] (!%p174_p3) }
   0xa   : > { %716 = vmatpush1.bf16.msra.mxu0 (!%p174_p3), %v715_v8  ;;  %743 = vmatpush1.bf16.msra.mxu1 (!%p174_p3), %v715_v8  ;;  %v721_v15 = vpack.c.bf16 (!%p174_p3), %v270_v13, %v268_v12  ;;  %v272_v18 = vld [vmem:[%s1076_s1 + $0x68] sm:$0xff] (!%p174_p3)  ;;  %v274_v19 = vld [vmem:[%s1076_s1 + $0x78] sm:$0xff] (!%p174_p3)  ;;  %v723_v20 = vpack.c.bf16 (!%p174_p3), %v269_v17, %v267_v16  ;;  %v271_v22 = vld [vmem:[%s1076_s1 + $0x60] sm:$0xff] (!%p174_p3)  ;;  %v287_v58 = vsub.s32 (!%p174_p3), 0, %v286_v57  ;;  %v291_v60 = vsub.s32 (!%p174_p3), 1, %v286_v57 }
   0xb   : > { %718 = vmatprep.subr.bf16.mxu0 (!%p174_p3), %v717_v9  ;;  %738 = vmatprep.subr.bf16.mxu1 (!%p174_p3), %v717_v9  ;;  %v725_v21 = vpack.c.bf16 (!%p174_p3), %v274_v19, %v272_v18  ;;  %v273_v23 = vld [vmem:[%s1076_s1 + $0x70] sm:$0xff] (!%p174_p3)  ;;  %v276_v24 = vld [vmem:[%s1076_s1 + $0x88] sm:$0xff] (!%p174_p3)  ;;  %v278_v25 = vld [vmem:[%s1076_s1 + $0x98] sm:$0xff] (!%p174_p3) }
   0xc   : > { %v727_v26 = vpack.c.bf16 (!%p174_p3), %v273_v23, %v271_v22  ;;  %v729_v27 = vpack.c.bf16 (!%p174_p3), %v278_v25, %v276_v24  ;;  %v275_v28 = vld [vmem:[%s1076_s1 + $0x80] sm:$0xff] (!%p174_p3)  ;;  %v277_v29 = vld [vmem:[%s1076_s1 + $0x90] sm:$0xff] (!%p174_p3)  ;;  %v280_v30 = vld [vmem:[%s1076_s1 + $0xa8] sm:$0xff] (!%p174_p3) }
   0xd   : > { %v282_v31 = vld [vmem:[%s1076_s1 + $0xb8] sm:$0xff] (!%p174_p3)  ;;  %v731_v32 = vpack.c.bf16 (!%p174_p3), %v277_v29, %v275_v28  ;;  %v279_v34 = vld [vmem:[%s1076_s1 + $0xa0] sm:$0xff] (!%p174_p3)  ;;  %v281_v35 = vld [vmem:[%s1076_s1 + $0xb0] sm:$0xff] (!%p174_p3) }
   0xe   : > { %720 = vmatpush1.bf16.msra.mxu0 %v719_v14  ;;  %744 = vmatpush1.bf16.msra.mxu1 %v719_v14  ;;  %s1084_s21 = smov (!%p212_p4, %s211_s21), 37  ;;  %v733_v33 = vpack.c.bf16 %v282_v31, %v280_v30  ;;  %v735_v36 = vpack.c.bf16 %v281_v35, %v279_v34  ;;  %v283_v59 = vld [vmem:[%s1077_s2] sm:$0x3] }
   0xf   : > { %722 = vmatprep.subr.bf16.mxu0 %v721_v15  ;;  %739 = vmatprep.subr.bf16.mxu1 %v721_v15  ;;  %s688_s18 = sshll.u32 %s1084_s21, 3  ;;  %s712_s25 = sshll.u32 %s1084_s21, 4  ;;  %v981_v61 = vrot.slane %v283_v59, %v287_v58  ;;  %v983_v62 = vrot.slane %v283_v59, %v291_v60 }
  0x10   : > { %s920_s22 = scalar_lea.vmem %s1075_s0, %s688_s18  ;;  %s988_s28 = scalar_lea.vmem %s1078_s3, %s712_s25 }
  0x11   : > { %v240_v37 = vld [vmem:[%s920_s22] sm:$0xff]  ;;  %v250_v38 = vld [vmem:[%s920_s22 + $0x50] sm:$0xff]  ;;  %v241_v39 = vld [vmem:[%s920_s22 + $0x8] sm:$0xff] }
  0x12   : > { %724 = vmatpush1.bf16.msra.mxu0 %v723_v20  ;;  %745 = vmatpush1.bf16.msra.mxu1 %v723_v20  ;;  %v251_v40 = vld [vmem:[%s920_s22 + $0x58] sm:$0xff]  ;;  %v242_v41 = vld [vmem:[%s920_s22 + $0x10] sm:$0xff]  ;;  %v252_v42 = vld [vmem:[%s920_s22 + $0x60] sm:$0xff] }
  0x13   : > { %726 = vmatprep.subr.bf16.mxu0 %v725_v21  ;;  %740 = vmatprep.subr.bf16.mxu1 %v725_v21  ;;  %v243_v43 = vld [vmem:[%s920_s22 + $0x18] sm:$0xff]  ;;  %v253_v44 = vld [vmem:[%s920_s22 + $0x68] sm:$0xff]  ;;  %v244_v45 = vld [vmem:[%s920_s22 + $0x20] sm:$0xff] }
  0x14   : > { %v254_v46 = vld [vmem:[%s920_s22 + $0x70] sm:$0xff]  ;;  %v245_v47 = vld [vmem:[%s920_s22 + $0x28] sm:$0xff]  ;;  %v255_v48 = vld [vmem:[%s920_s22 + $0x78] sm:$0xff] }
  0x15   : > { %v246_v49 = vld [vmem:[%s920_s22 + $0x30] sm:$0xff]  ;;  %v256_v50 = vld [vmem:[%s920_s22 + $0x80] sm:$0xff]  ;;  %v247_v51 = vld [vmem:[%s920_s22 + $0x38] sm:$0xff] }
  0x16   : > { %728 = vmatpush1.bf16.msra.mxu0 %v727_v26  ;;  %746 = vmatpush1.bf16.msra.mxu1 %v727_v26  ;;  %v257_v52 = vld [vmem:[%s920_s22 + $0x88] sm:$0xff]  ;;  %v248_v53 = vld [vmem:[%s920_s22 + $0x40] sm:$0xff]  ;;  %v258_v54 = vld [vmem:[%s920_s22 + $0x90] sm:$0xff] }
  0x17   : > { %730 = vmatprep.subr.bf16.mxu0 %v729_v27  ;;  %741 = vmatprep.subr.bf16.mxu1 %v729_v27  ;;  %v249_v55 = vld [vmem:[%s920_s22 + $0x48] sm:$0xff] }
  0x1a   : > { %732 = vmatpush1.bf16.msra.mxu0 %v731_v32  ;;  %747 = vmatpush1.bf16.msra.mxu1 %v731_v32 }
  0x1b   : > { %734 = vmatprep.subr.bf16.mxu0 %v733_v33  ;;  %742 = vmatprep.subr.bf16.mxu1 %v733_v33 }
  0x1e   : > { %736 = vmatpush1.bf16.msra.mxu0 %v735_v36  ;;  %748 = vmatpush1.bf16.msra.mxu1 %v735_v36 }
  0x21   : > { %691 = vmatmul.mubr.msk.f32.vlgmr.msra.gmra.mrb[0].mxu0 %vm295_vm0, %v240_v37  ;;  %701 = vmatmul.mubr.msk.f32.vlgmr.msra.gmra.mrb[0].mxu1 %vm295_vm0, %v250_v38 }
  0x22   : > { %423 = vmatprep.mubr.f32.mxu0 %v798_v7  ;;  %483 = vmatprep.mubr.f32.mxu1 %v798_v7 }
  0x25   : > { %692 = vmatmul.mubr.msk.f32.gmra.mrb[2].mxu0 %vm295_vm0, %v241_v39  ;;  %702 = vmatmul.mubr.msk.f32.gmra.mrb[2].mxu1 %vm295_vm0, %v251_v40 }
  0x26   : > { %429 = vmatprep.mubr.f32.mxu0 %v798_v7  ;;  %489 = vmatprep.mubr.f32.mxu1 %v798_v7 }
  0x29   : > { %693 = vmatmul.mubr.msk.f32.gmra.mrb[4].mxu0 %vm295_vm0, %v242_v41  ;;  %703 = vmatmul.mubr.msk.f32.gmra.mrb[4].mxu1 %vm295_vm0, %v252_v42 }
  0x2a   : > { %435 = vmatprep.mubr.f32.mxu0 %v798_v7  ;;  %495 = vmatprep.mubr.f32.mxu1 %v798_v7 }
  0x2d   : > { %694 = vmatmul.mubr.msk.f32.gmra.mrb[6].mxu0 %vm295_vm0, %v243_v43  ;;  %704 = vmatmul.mubr.msk.f32.gmra.mrb[6].mxu1 %vm295_vm0, %v253_v44 }
  0x2e   : > { %441 = vmatprep.mubr.f32.mxu0 %v798_v7  ;;  %501 = vmatprep.mubr.f32.mxu1 %v798_v7 }
  0x31   : > { %695 = vmatmul.mubr.msk.f32.gmra.mrb[8].mxu0 %vm295_vm0, %v244_v45  ;;  %705 = vmatmul.mubr.msk.f32.gmra.mrb[8].mxu1 %vm295_vm0, %v254_v46 }
  0x32   : > { %447 = vmatprep.mubr.f32.mxu0 %v798_v7  ;;  %507 = vmatprep.mubr.f32.mxu1 %v798_v7 }
  0x35   : > { %696 = vmatmul.mubr.msk.f32.gmra.mrb[10].mxu0 %vm295_vm0, %v245_v47  ;;  %706 = vmatmul.mubr.msk.f32.gmra.mrb[10].mxu1 %vm295_vm0, %v255_v48 }
  0x36   : > { %453 = vmatprep.mubr.f32.mxu0 %v798_v7  ;;  %513 = vmatprep.mubr.f32.mxu1 %v798_v7 }
  0x39   : > { %697 = vmatmul.mubr.msk.f32.gmra.mrb[12].mxu0 %vm295_vm0, %v246_v49  ;;  %707 = vmatmul.mubr.msk.f32.gmra.mrb[12].mxu1 %vm295_vm0, %v256_v50 }
  0x3a   : > { %459 = vmatprep.mubr.f32.mxu0 %v798_v7  ;;  %519 = vmatprep.mubr.f32.mxu1 %v798_v7 }
  0x3d   : > { %698 = vmatmul.mubr.msk.f32.gmra.mrb[14].mxu0 %vm295_vm0, %v247_v51  ;;  %708 = vmatmul.mubr.msk.f32.gmra.mrb[14].mxu1 %vm295_vm0, %v257_v52 }
  0x3e   : > { %465 = vmatprep.mubr.f32.mxu0 %v798_v7  ;;  %525 = vmatprep.mubr.f32.mxu1 %v798_v7 }
  0x41   : > { %699 = vmatmul.mubr.msk.f32.gmra.mrb[16].mxu0 %vm295_vm0, %v248_v53  ;;  %709 = vmatmul.mubr.msk.f32.gmra.mrb[16].mxu1 %vm295_vm0, %v258_v54 }
  0x42   : > { %471 = vmatprep.mubr.f32.mxu0 %v798_v7 }
  0x45   : > { %700 = vmatmul.mubr.msk.f32.gmra.mrb[18].mxu0 %vm295_vm0, %v249_v55 }
  0xf4   : > { %v419_v63 = vpop.f32.mrb[0].mxu0  ;;  %v479_v0 = vpop.f32.mrb[0].mxu1 }
  0xf5   : > { %v420_v1 = vadd.f32 %v419_v63, %v981_v61  ;;  %v421_v2 = vpop.f32.mrb[1].mxu0  ;;  %v480_v3 = vadd.f32 %v479_v0, %v981_v61  ;;  %v481_v4 = vpop.f32.mrb[1].mxu1 }
  0xf6   : > { %v422_v5 = vadd.f32 %v421_v2, %v983_v62  ;;  %v482_v6 = vadd.f32 %v481_v4, %v983_v62 }
  0xf7   : > { %532 = vst [vmem:[%s988_s28] sm:$0xff] %v420_v1  ;;  %552 = vst [vmem:[%s988_s28 + $0xa0] sm:$0xff] %v480_v3 }
  0xf8   : > { %533 = vst [vmem:[%s988_s28 + $0x8] sm:$0xff] %v422_v5  ;;  %v425_v7 = vpop.f32.mrb[2].mxu0  ;;  %553 = vst [vmem:[%s988_s28 + $0xa8] sm:$0xff] %v482_v6  ;;  %v485_v8 = vpop.f32.mrb[2].mxu1 }
  0xf9   : > { %v426_v9 = vadd.f32 %v425_v7, %v981_v61  ;;  %v427_v10 = vpop.f32.mrb[3].mxu0  ;;  %v486_v11 = vadd.f32 %v485_v8, %v981_v61  ;;  %v487_v12 = vpop.f32.mrb[3].mxu1 }
  0xfa   : > { %v428_v13 = vadd.f32 %v427_v10, %v983_v62  ;;  %v488_v14 = vadd.f32 %v487_v12, %v983_v62 }
  0xfb   : > { %534 = vst [vmem:[%s988_s28 + $0x10] sm:$0xff] %v426_v9  ;;  %554 = vst [vmem:[%s988_s28 + $0xb0] sm:$0xff] %v486_v11 }
  0xfc   : > { %535 = vst [vmem:[%s988_s28 + $0x18] sm:$0xff] %v428_v13  ;;  %v431_v15 = vpop.f32.mrb[4].mxu0  ;;  %555 = vst [vmem:[%s988_s28 + $0xb8] sm:$0xff] %v488_v14  ;;  %v491_v16 = vpop.f32.mrb[4].mxu1 }
  0xfd   : > { %v432_v17 = vadd.f32 %v431_v15, %v981_v61  ;;  %v433_v18 = vpop.f32.mrb[5].mxu0  ;;  %v492_v19 = vadd.f32 %v491_v16, %v981_v61  ;;  %v493_v20 = vpop.f32.mrb[5].mxu1 }
  0xfe   : > { %v434_v21 = vadd.f32 %v433_v18, %v983_v62  ;;  %v494_v22 = vadd.f32 %v493_v20, %v983_v62 }
  0xff   : > { %536 = vst [vmem:[%s988_s28 + $0x20] sm:$0xff] %v432_v17  ;;  %556 = vst [vmem:[%s988_s28 + $0xc0] sm:$0xff] %v492_v19 }
 0x100   : > { %537 = vst [vmem:[%s988_s28 + $0x28] sm:$0xff] %v434_v21  ;;  %v437_v23 = vpop.f32.mrb[6].mxu0  ;;  %557 = vst [vmem:[%s988_s28 + $0xc8] sm:$0xff] %v494_v22  ;;  %v497_v24 = vpop.f32.mrb[6].mxu1 }
 0x101   : > { %v438_v25 = vadd.f32 %v437_v23, %v981_v61  ;;  %v439_v26 = vpop.f32.mrb[7].mxu0  ;;  %v498_v27 = vadd.f32 %v497_v24, %v981_v61  ;;  %v499_v28 = vpop.f32.mrb[7].mxu1 }
 0x102   : > { %v440_v29 = vadd.f32 %v439_v26, %v983_v62  ;;  %v500_v30 = vadd.f32 %v499_v28, %v983_v62 }
 0x103   : > { %538 = vst [vmem:[%s988_s28 + $0x30] sm:$0xff] %v438_v25  ;;  %558 = vst [vmem:[%s988_s28 + $0xd0] sm:$0xff] %v498_v27 }
 0x104   : > { %539 = vst [vmem:[%s988_s28 + $0x38] sm:$0xff] %v440_v29  ;;  %v443_v31 = vpop.f32.mrb[8].mxu0  ;;  %559 = vst [vmem:[%s988_s28 + $0xd8] sm:$0xff] %v500_v30  ;;  %v503_v32 = vpop.f32.mrb[8].mxu1 }
 0x105   : > { %v444_v33 = vadd.f32 %v443_v31, %v981_v61  ;;  %v445_v34 = vpop.f32.mrb[9].mxu0  ;;  %v504_v35 = vadd.f32 %v503_v32, %v981_v61  ;;  %v505_v36 = vpop.f32.mrb[9].mxu1 }
 0x106   : > { %v446_v37 = vadd.f32 %v445_v34, %v983_v62  ;;  %v506_v38 = vadd.f32 %v505_v36, %v983_v62 }
 0x107   : > { %540 = vst [vmem:[%s988_s28 + $0x40] sm:$0xff] %v444_v33  ;;  %560 = vst [vmem:[%s988_s28 + $0xe0] sm:$0xff] %v504_v35 }
 0x108   : > { %541 = vst [vmem:[%s988_s28 + $0x48] sm:$0xff] %v446_v37  ;;  %v449_v39 = vpop.f32.mrb[10].mxu0  ;;  %561 = vst [vmem:[%s988_s28 + $0xe8] sm:$0xff] %v506_v38  ;;  %v509_v40 = vpop.f32.mrb[10].mxu1 }
 0x109   : > { %v450_v41 = vadd.f32 %v449_v39, %v981_v61  ;;  %v451_v42 = vpop.f32.mrb[11].mxu0  ;;  %v510_v43 = vadd.f32 %v509_v40, %v981_v61  ;;  %v511_v44 = vpop.f32.mrb[11].mxu1 }
 0x10a   : > { %v452_v45 = vadd.f32 %v451_v42, %v983_v62  ;;  %v512_v46 = vadd.f32 %v511_v44, %v983_v62 }
 0x10b   : > { %542 = vst [vmem:[%s988_s28 + $0x50] sm:$0xff] %v450_v41  ;;  %562 = vst [vmem:[%s988_s28 + $0xf0] sm:$0xff] %v510_v43 }
 0x10c   : > { %543 = vst [vmem:[%s988_s28 + $0x58] sm:$0xff] %v452_v45  ;;  %v455_v47 = vpop.f32.mrb[12].mxu0  ;;  %563 = vst [vmem:[%s988_s28 + $0xf8] sm:$0xff] %v512_v46  ;;  %v515_v48 = vpop.f32.mrb[12].mxu1 }
 0x10d   : > { %v456_v49 = vadd.f32 %v455_v47, %v981_v61  ;;  %v457_v50 = vpop.f32.mrb[13].mxu0  ;;  %v516_v51 = vadd.f32 %v515_v48, %v981_v61  ;;  %v517_v52 = vpop.f32.mrb[13].mxu1 }
 0x10e   : > { %v458_v53 = vadd.f32 %v457_v50, %v983_v62  ;;  %v518_v54 = vadd.f32 %v517_v52, %v983_v62 }
 0x10f   : > { %544 = vst [vmem:[%s988_s28 + $0x60] sm:$0xff] %v456_v49  ;;  %564 = vst [vmem:[%s988_s28 + $0x100] sm:$0xff] %v516_v51 }
 0x110   : > { %545 = vst [vmem:[%s988_s28 + $0x68] sm:$0xff] %v458_v53  ;;  %v461_v55 = vpop.f32.mrb[14].mxu0  ;;  %565 = vst [vmem:[%s988_s28 + $0x108] sm:$0xff] %v518_v54  ;;  %v521_v56 = vpop.f32.mrb[14].mxu1 }
 0x111   : > { %v462_v57 = vadd.f32 %v461_v55, %v981_v61  ;;  %v463_v58 = vpop.f32.mrb[15].mxu0  ;;  %v522_v59 = vadd.f32 %v521_v56, %v981_v61  ;;  %v523_v60 = vpop.f32.mrb[15].mxu1 }
 0x112   : > { %v464_v63 = vadd.f32 %v463_v58, %v983_v62  ;;  %v524_v0 = vadd.f32 %v523_v60, %v983_v62 }
 0x113   : > { %546 = vst [vmem:[%s988_s28 + $0x70] sm:$0xff] %v462_v57  ;;  %566 = vst [vmem:[%s988_s28 + $0x110] sm:$0xff] %v522_v59 }
 0x114   : > { %547 = vst [vmem:[%s988_s28 + $0x78] sm:$0xff] %v464_v63  ;;  %v467_v1 = vpop.f32.mrb[16].mxu0  ;;  %567 = vst [vmem:[%s988_s28 + $0x118] sm:$0xff] %v524_v0  ;;  %v527_v2 = vpop.f32.mrb[16].mxu1 }
 0x115   : > { %v468_v3 = vadd.f32 %v467_v1, %v981_v61  ;;  %v469_v4 = vpop.f32.mrb[17].mxu0  ;;  %v528_v5 = vadd.f32 %v527_v2, %v981_v61  ;;  %v529_v6 = vpop.f32.mrb[17].mxu1 }
 0x116   : > { %v470_v7 = vadd.f32 %v469_v4, %v983_v62  ;;  %v530_v8 = vadd.f32 %v529_v6, %v983_v62 }
 0x117   : > { %548 = vst [vmem:[%s988_s28 + $0x80] sm:$0xff] %v468_v3  ;;  %568 = vst [vmem:[%s988_s28 + $0x120] sm:$0xff] %v528_v5 }
 0x118   : > { %549 = vst [vmem:[%s988_s28 + $0x88] sm:$0xff] %v470_v7  ;;  %v473_v9 = vpop.f32.mrb[18].mxu0  ;;  %569 = vst [vmem:[%s988_s28 + $0x128] sm:$0xff] %v530_v8 }
 0x119   : > { %v474_v10 = vadd.f32 %v473_v9, %v981_v61  ;;  %v475_v11 = vpop.f32.mrb[19].mxu0 }
 0x11a   : > { %v476_v12 = vadd.f32 %v475_v11, %v983_v62 }
 0x11b   : > { %550 = vst [vmem:[%s988_s28 + $0x90] sm:$0xff] %v474_v10 }
 0x11c   : > { %551 = vst [vmem:[%s988_s28 + $0x98] sm:$0xff] %v476_v12 }
 0x11d PF: > { %s13_s14 = sadd.s32 1, %s796_s14   ;;  %s1079_s12 = smov %s792_s13 }
 0x11e   : > { %p10_p5 = scmp.ge.s32.totalorder %s13_s14, 4   ;;  %s1080_s13 = smov %s1082_s15 }
 0x120   :  { %12 = sbr.rel (!%p10_p5) target bundleno = 2 (0x2), region = 68 }

</bundles_post_ra>
